<compile_context>
chip_gen: v5e
topology: v5e:2x2
jax: 0.10.0
libtpu: 0.0.40
codegen_flags: <defaults>
</compile_context>

<pallas_src>
import jax
import jax.numpy as jnp
from jax.experimental import pallas as pl
from jax.experimental.pallas import tpu as pltpu


def _norm_kernel(x_ref, o_ref):
    # Block is (B, tile_f): the whole batch is resident; reduce over axis 0.
    b = x_ref.shape[0]
    # Pass 1: per-column mean (f32 accumulation).
    mean = jnp.sum(x_ref[...].astype(jnp.float32), axis=0, keepdims=True) / jnp.float32(b)
    # Pass 2: per-column centered sum of squares (two-pass -> numerically robust).
    d = x_ref[...].astype(jnp.float32) - mean
    # Unbiased variance (ddof=1), matching torch.std default; b == 1 -> 0/0 -> NaN like torch.
    var = jnp.sum(d * d, axis=0, keepdims=True) / jnp.float32(b - 1)
    std = jnp.sqrt(var)
    # (1, tile_f) reciprocal on the EUP; keep approx=False to preserve the
    # (std + 1e-8) epsilon semantics within tight tolerances.
    inv = pl.reciprocal(std + 1e-8, approx=False)
    # Pass 3: recompute (x - mean) * inv from the ref for the store.
    o_ref[...] = ((x_ref[...].astype(jnp.float32) - mean) * inv).astype(o_ref.dtype)


def _round_up(x, m):
    return -(-x // m) * m


def _vmem_capacity_bytes():
    """Physical per-TensorCore VMEM, with a conservative fallback."""
    try:
        cap = int(getattr(pltpu.get_tpu_info(), "vmem_capacity_bytes", 0))
        if cap > 0:
            return cap
    except Exception:
        pass
    return 64 << 20  # smallest current generation (v7x per-TC VMEM)


def _pick_tile_f(total_f, batch, itemsize, budget_bytes):
    """Bytes-based tile width (multiple of 128 lanes) for blocks (B, tile_f)."""
    b_pad = _round_up(batch, 8)  # (B, t) tiles are stored as (ceil(B/8)*8, t)
    # Per lane-column bytes: double-buffered input + output blocks in the I/O
    # dtype, plus one f32 block of allowance for in-kernel intermediates
    # (covers the f32 upcast path for bf16 inputs as well).
    bytes_per_col = b_pad * (4 * itemsize + 4)
    cap = max(128, (budget_bytes // bytes_per_col) // 128 * 128)
    f_aligned = _round_up(total_f, 128)
    if f_aligned <= cap:
        return f_aligned  # single fat block, no step overhead at all
    # Several steps: balance tile sizes so the last block isn't tiny while each
    # step stays at multi-MiB HBM traffic (well above the ~0.35 us step cost).
    n_steps = -(-f_aligned // cap)
    tile = _round_up(-(-f_aligned // n_steps), 128)
    return min(tile, cap)


def norm_forward(x):
    """x: [B, C, H, W] -> [B, C, H, W], normalized over the batch dim (dim 0)."""
    B, C, H, W = x.shape
    F = C * H * W
    xf = x.reshape(B, F)  # contiguous view; no extra HBM pass

    itemsize = jnp.dtype(x.dtype).itemsize
    vmem_cap = _vmem_capacity_bytes()
    # ~62.5% of physical VMEM for the pipelined blocks, ~75% as the compiler
    # scoped limit: 40 / 48 MiB on v7x, 80 / 96 MiB on v5e / v6e.
    tile_f = _pick_tile_f(F, B, itemsize, budget_bytes=(vmem_cap * 5) // 8)
    vmem_limit = int((vmem_cap * 3) // 4)

    # TODO(synk): only if B grows so large (~>10k for f32) that even a 128-lane
    # block blows the VMEM budget, switch to a 2-D grid with per-column running
    # sum / sum-of-squares accumulators (costs an extra HBM pass, so deferred).
    out = pl.pallas_call(
        _norm_kernel,
        out_shape=jax.ShapeDtypeStruct((B, F), x.dtype),
        grid_spec=pltpu.PrefetchScalarGridSpec(
            num_scalar_prefetch=0,
            grid=(pl.cdiv(F, tile_f),),
            in_specs=[pl.BlockSpec((B, tile_f), lambda i: (0, i))],
            out_specs=pl.BlockSpec((B, tile_f), lambda i: (0, i)),
        ),
        compiler_params=pltpu.CompilerParams(
            dimension_semantics=("parallel",),
            vmem_limit_bytes=vmem_limit,
        ),
    )(xf)

    return out.reshape(B, C, H, W)


def _norm_reference(x):
    mean = jnp.mean(x, axis=0, keepdims=True)
    std = jnp.std(x, axis=0, keepdims=True, ddof=1)  # torch.std default: unbiased
    return (x - mean) / (std + 1e-8)


if __name__ == "__main__":
    key = jax.random.PRNGKey(0)
    x = jax.random.normal(key, (2, 4, 16, 16), dtype=jnp.float32)

    y = jax.block_until_ready(norm_forward(x))

    y_ref = _norm_reference(x)
    assert y.shape == x.shape and y.dtype == x.dtype
    assert jnp.allclose(y, y_ref, atol=1e-5, rtol=1e-5)

    print("KERNEL_OK")
</pallas_src>

<mosaic_0001>
module attributes {stable_mosaic.version = 11 : i64} {
  func.func @_norm_kernel(%arg0: i32, %arg1: memref<2x1024xf32, #tpu.memory_space<vmem>>, %arg2: memref<2x1024xf32, #tpu.memory_space<vmem>>) attributes {dimension_semantics = [#tpu.dimension_semantics<parallel>], iteration_bounds = array<i64: 1>, scalar_prefetch = 0 : i64, scratch_operands = 0 : i64, tpu.core_type = #tpu.core_type<tc>, window_params = [{transform_indices = @transform_0, window_bounds = array<i64: 2, 1024>}, {transform_indices = @transform_1, window_bounds = array<i64: 2, 1024>}]} {
    %c0 = arith.constant 0 : index
    %c0_0 = arith.constant 0 : index
    %0 = vector.load %arg1[%c0, %c0_0] : memref<2x1024xf32, #tpu.memory_space<vmem>>, vector<2x1024xf32>
    %cst = arith.constant dense<0.000000e+00> : vector<1024xf32>
    %1 = vector.multi_reduction <add>, %0, %cst [0] : vector<2x1024xf32> to vector<1024xf32>
    %2 = vector.shape_cast %1 : vector<1024xf32> to vector<1x1024xf32>
    %cst_1 = arith.constant 2.000000e+00 : f32
    %3 = vector.broadcast %cst_1 : f32 to vector<1x1024xf32>
    %4 = arith.divf %2, %3 : vector<1x1024xf32>
    %c0_2 = arith.constant 0 : index
    %c0_3 = arith.constant 0 : index
    %5 = vector.load %arg1[%c0_2, %c0_3] : memref<2x1024xf32, #tpu.memory_space<vmem>>, vector<2x1024xf32>
    %6 = vector.broadcast %4 : vector<1x1024xf32> to vector<2x1024xf32>
    %7 = arith.subf %5, %6 : vector<2x1024xf32>
    %8 = arith.mulf %7, %7 : vector<2x1024xf32>
    %cst_4 = arith.constant dense<0.000000e+00> : vector<1024xf32>
    %9 = vector.multi_reduction <add>, %8, %cst_4 [0] : vector<2x1024xf32> to vector<1024xf32>
    %10 = vector.shape_cast %9 : vector<1024xf32> to vector<1x1024xf32>
    %cst_5 = arith.constant 1.000000e+00 : f32
    %11 = vector.broadcast %cst_5 : f32 to vector<1x1024xf32>
    %12 = arith.divf %10, %11 : vector<1x1024xf32>
    %13 = math.sqrt %12 : vector<1x1024xf32>
    %cst_6 = arith.constant 9.99999993E-9 : f32
    %14 = vector.broadcast %cst_6 : f32 to vector<1x1024xf32>
    %15 = arith.addf %13, %14 : vector<1x1024xf32>
    %16 = tpu.reciprocal %15 : vector<1x1024xf32> -> vector<1x1024xf32>
    %c0_7 = arith.constant 0 : index
    %c0_8 = arith.constant 0 : index
    %17 = vector.load %arg1[%c0_7, %c0_8] : memref<2x1024xf32, #tpu.memory_space<vmem>>, vector<2x1024xf32>
    %18 = vector.broadcast %4 : vector<1x1024xf32> to vector<2x1024xf32>
    %19 = arith.subf %17, %18 : vector<2x1024xf32>
    %20 = vector.broadcast %16 : vector<1x1024xf32> to vector<2x1024xf32>
    %21 = arith.mulf %19, %20 : vector<2x1024xf32>
    %c0_9 = arith.constant 0 : index
    %c0_10 = arith.constant 0 : index
    %22 = vector.load %arg2[%c0_9, %c0_10] : memref<2x1024xf32, #tpu.memory_space<vmem>>, vector<2x1024xf32>
    tpu.vector_store %arg2[%c0_9, %c0_10], %21 {strides = array<i32>} : memref<2x1024xf32, #tpu.memory_space<vmem>>, vector<2x1024xf32>,
    return
  }
  func.func @transform_0(%arg0: i32) -> (i32, i32) {
    %c0_i32 = arith.constant 0 : i32
    %c0_i32_0 = arith.constant 0 : i32
    return %c0_i32, %arg0 : i32, i32
  }
  func.func @transform_1(%arg0: i32) -> (i32, i32) {
    %c0_i32 = arith.constant 0 : i32
    %c0_i32_0 = arith.constant 0 : i32
    return %c0_i32, %arg0 : i32, i32
  }
}

</mosaic_0001>

<bundles_post_ra>
// kernel: tpu_custom_call.1
= control target key start
LH: loop header
LB: loop body
LE: loop exit
PB: predicated region body
PF: predicated region fallthrough
CT: control target
= control target key end

     0   :  { %6 = vsyncpa [#allocation3], 0  ;;  %s875_s0 = inlined_call_operand.hbm [shape: f32[2,1024], index: 0, kind: input, shape index: {}]   ;;  %s876_s1 = inlined_call_operand.hbm [shape: f32[2,1024], index: 1, kind: output, shape index: {}]  }
   0x1   :  { %7 = vsyncpa [#allocation4], 0  ;;  %s13_s8 = sshll.u32 %s875_s0, 4  ;;  %s571_s9 = smov [#allocation2]   ;;  %s14_s8 = int_to_ptr.hbm [resolvable:$true] %s13_s8 }
   0x2   :  { %s15_s10 = sshll.u32 %s571_s9, 4  ;;  %s16_s10 = int_to_ptr.vmem [resolvable:$true] %s15_s10 }
   0x3   :  { %18 = dma.hbm_to_vmem [thread:$0]  %s14_s8, 256, %s16_s10, [#allocation3]  }
   0x4   :  { %567 = dma.done.wait [#allocation3], 256  }
   0x5   :  { %568 = vsyncadd [#allocation3], 4294967040  ;;  %v572_v0 = vmov 2.0   ;;  %v587_v2 = vld [vmem:[#allocation2] sm:$0xff]  ;;  %v589_v3 = vld [vmem:[#allocation2 + $0x8] sm:$0xff]  ;;  %vm879_vm0 = vcmask 1041408  }
   0x6   :  { %485 = vrcp.f32 %v572_v0  ;;  %27 = vst [vmem:[#allocation1] ss:$4 sm:$0xff] %v587_v2  ;;  %vm878_vm2 = vcmask 1045508   ;;  %vm877_vm3 = vcmask 1043456   ;;  %s573_s0 = smov [#allocation5]   ;;  %s472_s14 = sshll.u32 %s876_s1, 4  ;;  %s473_s14 = int_to_ptr.hbm [resolvable:$true] %s472_s14 }
   0x7   :  { %29 = vst [vmem:[#allocation1 + $0x20] ss:$4 sm:$0xff] %v589_v3  ;;  %s470_s11 = sshll.u32 %s573_s0, 4  ;;  %s471_s11 = int_to_ptr.vmem [resolvable:$true] %s470_s11 }
   0xc   :  { %v486_v1 = vpop.eup %485 }
   0xd   :  { %v104_v4 = vmul.f32 2.0, %v486_v1  ;;  %v30_v7 = vld.sshfl [vmem:[#allocation1] sm:$0xff pattern:$0x73625140]  ;;  %vm108_vm1 = vweird.f32 %v486_v1 }
   0xe   :  { %v31_v8 = vld.sshfl [vmem:[#allocation1 + $0x8] sm:$0xff pattern:$0x73625140]  ;;  %v32_v10 = vld.sshfl [vmem:[#allocation1 + $0x10] sm:$0xff pattern:$0x73625140] }
   0xf   :  { %v105_v5 = vsub.f32 1.0, %v104_v4  ;;  %v33_v11 = vld.sshfl [vmem:[#allocation1 + $0x18] sm:$0xff pattern:$0x73625140]  ;;  %v47_v12 = vsel %vm879_vm0, %v30_v7, 0.0  ;;  %v54_v13 = vsel %vm879_vm0, %v31_v8, 0.0 }
  0x10   :  { %v61_v14 = vsel %vm879_vm0, %v32_v10, 0.0  ;;  %v68_v15 = vsel %vm879_vm0, %v33_v11, 0.0  ;;  %v48_v16 = vrot.slane %v47_v12, 4  ;;  %v55_v17 = vrot.slane %v54_v13, 4 }
  0x11   :  { %v106_v6 = vmul.f32 %v486_v1, %v105_v5  ;;  %v62_v18 = vrot.slane %v61_v14, 4  ;;  %v69_v19 = vrot.slane %v68_v15, 4  ;;  %v34_v21 = vld.sshfl [vmem:[#allocation1 + $0x20] sm:$0xff pattern:$0x73625140] }
  0x12   :  { %v35_v22 = vld.sshfl [vmem:[#allocation1 + $0x28] sm:$0xff pattern:$0x73625140]  ;;  %v49_v23 = vadd.f32 %v48_v16, %v47_v12  ;;  %v56_v24 = vadd.f32 %v55_v17, %v54_v13  ;;  %v36_v27 = vld.sshfl [vmem:[#allocation1 + $0x30] sm:$0xff pattern:$0x73625140] }
  0x13   :  { %v107_v9 = vadd.f32 %v486_v1, %v106_v6  ;;  %v63_v25 = vadd.f32 %v62_v18, %v61_v14  ;;  %v70_v26 = vadd.f32 %v69_v19, %v68_v15  ;;  %v37_v28 = vld.sshfl [vmem:[#allocation1 + $0x38] sm:$0xff pattern:$0x73625140]  ;;  %v75_v29 = vsel %vm879_vm0, %v34_v21, 0.0 }
  0x14   :  { %v82_v30 = vsel %vm879_vm0, %v35_v22, 0.0  ;;  %v89_v31 = vsel %vm879_vm0, %v36_v27, 0.0  ;;  %v96_v32 = vsel %vm879_vm0, %v37_v28, 0.0  ;;  %v50_v33 = vrot.slane %v49_v23, 2 }
  0x15   :  { %v597_v20 = vsel %vm108_vm1, %v486_v1, %v107_v9  ;;  %v57_v34 = vrot.slane %v56_v24, 2  ;;  %v64_v35 = vrot.slane %v63_v25, 2  ;;  %v71_v36 = vrot.slane %v70_v26, 2 }
  0x16   :  { %v76_v37 = vrot.slane %v75_v29, 4  ;;  %v83_v38 = vrot.slane %v82_v30, 4  ;;  %v90_v39 = vrot.slane %v89_v31, 4  ;;  %v97_v40 = vrot.slane %v96_v32, 4 }
  0x17   :  { %v51_v41 = vadd.f32 %v50_v33, %v49_v23  ;;  %v58_v42 = vadd.f32 %v57_v34, %v56_v24  ;;  %v65_v43 = vadd.f32 %v64_v35, %v63_v25  ;;  %v72_v44 = vadd.f32 %v71_v36, %v70_v26 }
  0x18   :  { %v77_v45 = vadd.f32 %v76_v37, %v75_v29  ;;  %v84_v46 = vadd.f32 %v83_v38, %v82_v30  ;;  %v91_v47 = vadd.f32 %v90_v39, %v89_v31  ;;  %v98_v48 = vadd.f32 %v97_v40, %v96_v32 }
  0x19   :  { %v52_v49 = vrot.slane %v51_v41, 1  ;;  %v59_v50 = vrot.slane %v58_v42, 1  ;;  %v66_v51 = vrot.slane %v65_v43, 1  ;;  %v73_v52 = vrot.slane %v72_v44, 1 }
  0x1a   :  { %v78_v53 = vrot.slane %v77_v45, 2  ;;  %v85_v54 = vrot.slane %v84_v46, 2  ;;  %v92_v55 = vrot.slane %v91_v47, 2  ;;  %v99_v56 = vrot.slane %v98_v48, 2 }
  0x1b   :  { %v53_v57 = vadd.f32 %v52_v49, %v51_v41  ;;  %v60_v58 = vadd.f32 %v59_v50, %v58_v42  ;;  %v67_v59 = vadd.f32 %v66_v51, %v65_v43  ;;  %v74_v60 = vadd.f32 %v73_v52, %v72_v44 }
  0x1c   :  { %v79_v61 = vadd.f32 %v78_v53, %v77_v45  ;;  %v86_v62 = vadd.f32 %v85_v54, %v84_v46  ;;  %v93_v63 = vadd.f32 %v92_v55, %v91_v47  ;;  %v100_v0 = vadd.f32 %v99_v56, %v98_v48 }
  0x1d   :  { %v111_v1 = vmul.f32 %v597_v20, %v60_v58  ;;  %v112_v4 = vmul.f32 %v597_v20, %v67_v59  ;;  %v113_v5 = vmul.f32 %v597_v20, %v74_v60  ;;  %v110_v10 = vmul.f32 %v597_v20, %v53_v57 }
  0x1e   :  { %v80_v6 = vrot.slane %v79_v61, 1  ;;  %v87_v7 = vrot.slane %v86_v62, 1  ;;  %v94_v8 = vrot.slane %v93_v63, 1  ;;  %v101_v9 = vrot.slane %v100_v0, 1 }
  0x1f   :  { %v126_v11 = vrot.slane %v111_v1, 6  ;;  %v127_v12 = vrot.slane %v112_v4, 4  ;;  %v128_v13 = vrot.slane %v113_v5, 2 }
  0x20   :  { %v81_v14 = vadd.f32 %v80_v6, %v79_v61  ;;  %v88_v15 = vadd.f32 %v87_v7, %v86_v62  ;;  %v95_v16 = vadd.f32 %v94_v8, %v93_v63  ;;  %v102_v17 = vadd.f32 %v101_v9, %v100_v0 }
  0x21   :  { %v132_v18 = vsel %vm879_vm0, %v110_v10, %v126_v11  ;;  %v134_v19 = vsel %vm878_vm2, %v127_v12, %v128_v13 }
  0x22   :  { %v136_v21 = vsel %vm877_vm3, %v132_v18, %v134_v19  ;;  %v115_v22 = vmul.f32 %v597_v20, %v88_v15  ;;  %v116_v23 = vmul.f32 %v597_v20, %v95_v16  ;;  %v117_v25 = vmul.f32 %v597_v20, %v102_v17 }
  0x23   :  { %v613_v24 = vsub.f32 %v587_v2, %v136_v21  ;;  %v114_v26 = vmul.f32 %v597_v20, %v81_v14 }
  0x24   :  { %v129_v27 = vrot.slane %v115_v22, 6  ;;  %v130_v28 = vrot.slane %v116_v23, 4  ;;  %v131_v30 = vrot.slane %v117_v25, 2 }
  0x25   :  { %v144_v29 = vmul.f32 %v613_v24, %v613_v24 }
  0x26   :  { %v137_v31 = vsel %vm879_vm0, %v114_v26, %v129_v27  ;;  %v138_v32 = vsel %vm878_vm2, %v130_v28, %v131_v30 }
  0x27   :  { %148 = vst [vmem:[#allocation1] ss:$4 sm:$0xff] %v144_v29  ;;  %v139_v33 = vsel %vm877_vm3, %v137_v31, %v138_v32 }
  0x28   :  { %v623_v2 = vsub.f32 %v589_v3, %v139_v33 }
  0x2a   :  { %v145_v34 = vmul.f32 %v623_v2, %v623_v2 }
  0x2c   :  { %150 = vst [vmem:[#allocation1 + $0x20] ss:$4 sm:$0xff] %v145_v34 }
  0x2e   :  { %v151_v20 = vld.sshfl [vmem:[#allocation1] sm:$0xff pattern:$0x73625140]  ;;  %v152_v35 = vld.sshfl [vmem:[#allocation1 + $0x8] sm:$0xff pattern:$0x73625140] }
  0x2f   :  { %v153_v36 = vld.sshfl [vmem:[#allocation1 + $0x10] sm:$0xff pattern:$0x73625140]  ;;  %v154_v37 = vld.sshfl [vmem:[#allocation1 + $0x18] sm:$0xff pattern:$0x73625140] }
  0x30   :  { %v167_v38 = vsel %vm879_vm0, %v151_v20, 0.0  ;;  %v174_v39 = vsel %vm879_vm0, %v152_v35, 0.0  ;;  %v181_v40 = vsel %vm879_vm0, %v153_v36, 0.0  ;;  %v188_v41 = vsel %vm879_vm0, %v154_v37, 0.0 }
  0x31   :  { %v168_v42 = vrot.slane %v167_v38, 4  ;;  %v175_v43 = vrot.slane %v174_v39, 4  ;;  %v182_v3 = vrot.slane %v181_v40, 4  ;;  %v189_v44 = vrot.slane %v188_v41, 4 }
  0x33   :  { %v169_v45 = vadd.f32 %v168_v42, %v167_v38  ;;  %v176_v46 = vadd.f32 %v175_v43, %v174_v39  ;;  %v183_v47 = vadd.f32 %v182_v3, %v181_v40  ;;  %v190_v48 = vadd.f32 %v189_v44, %v188_v41  ;;  %v155_v49 = vld.sshfl [vmem:[#allocation1 + $0x20] sm:$0xff pattern:$0x73625140]  ;;  %v156_v50 = vld.sshfl [vmem:[#allocation1 + $0x28] sm:$0xff pattern:$0x73625140] }
  0x34   :  { %v157_v51 = vld.sshfl [vmem:[#allocation1 + $0x30] sm:$0xff pattern:$0x73625140]  ;;  %v158_v52 = vld.sshfl [vmem:[#allocation1 + $0x38] sm:$0xff pattern:$0x73625140] }
  0x35   :  { %v170_v53 = vrot.slane %v169_v45, 2  ;;  %v177_v54 = vrot.slane %v176_v46, 2  ;;  %v184_v55 = vrot.slane %v183_v47, 2  ;;  %v191_v56 = vrot.slane %v190_v48, 2 }
  0x36   :  { %v195_v57 = vsel %vm879_vm0, %v155_v49, 0.0  ;;  %v202_v58 = vsel %vm879_vm0, %v156_v50, 0.0  ;;  %v209_v59 = vsel %vm879_vm0, %v157_v51, 0.0  ;;  %v216_v60 = vsel %vm879_vm0, %v158_v52, 0.0 }
  0x37   :  { %v171_v61 = vadd.f32 %v170_v53, %v169_v45  ;;  %v178_v62 = vadd.f32 %v177_v54, %v176_v46  ;;  %v185_v63 = vadd.f32 %v184_v55, %v183_v47  ;;  %v192_v0 = vadd.f32 %v191_v56, %v190_v48 }
  0x38   :  { %v196_v1 = vrot.slane %v195_v57, 4  ;;  %v203_v4 = vrot.slane %v202_v58, 4  ;;  %v210_v5 = vrot.slane %v209_v59, 4  ;;  %v217_v9 = vrot.slane %v216_v60, 4 }
  0x39   :  { %v172_v6 = vrot.slane %v171_v61, 1  ;;  %v179_v7 = vrot.slane %v178_v62, 1  ;;  %v186_v8 = vrot.slane %v185_v63, 1  ;;  %v193_v15 = vrot.slane %v192_v0, 1 }
  0x3a   :  { %v197_v10 = vadd.f32 %v196_v1, %v195_v57  ;;  %v204_v11 = vadd.f32 %v203_v4, %v202_v58  ;;  %v211_v12 = vadd.f32 %v210_v5, %v209_v59  ;;  %v218_v21 = vadd.f32 %v217_v9, %v216_v60 }
  0x3b   :  { %v635_v13 = vadd.f32 %v172_v6, %v171_v61  ;;  %v637_v14 = vadd.f32 %v179_v7, %v178_v62  ;;  %v639_v19 = vadd.f32 %v186_v8, %v185_v63  ;;  %v642_v26 = vadd.f32 %v193_v15, %v192_v0 }
  0x3c   :  { %v198_v16 = vrot.slane %v197_v10, 2  ;;  %v205_v17 = vrot.slane %v204_v11, 2  ;;  %v212_v18 = vrot.slane %v211_v12, 2  ;;  %v219_v30 = vrot.slane %v218_v21, 2 }
  0x3d   :  { %487 = vrsqrt.f32 %v635_v13  ;;  %vm230_vm4 = vcmp.eq.f32.partialorder %v635_v13, inf  ;;  %vm232_vm5 = vcmp.eq.f32.partialorder %v635_v13, 0.0  ;;  %v233_v44 = vand.u32 2147483648, %v635_v13 }
  0x3e   :  { %v199_v22 = vadd.f32 %v198_v16, %v197_v10  ;;  %v206_v23 = vadd.f32 %v205_v17, %v204_v11  ;;  %v213_v25 = vadd.f32 %v212_v18, %v211_v12  ;;  %489 = vrsqrt.f32 %v637_v14 }
  0x3f   :  { %491 = vrsqrt.f32 %v639_v19  ;;  %v220_v36 = vadd.f32 %v219_v30, %v218_v21  ;;  %vm242_vm6 = vcmp.eq.f32.partialorder %v637_v14, inf  ;;  %vm244_vm7 = vcmp.eq.f32.partialorder %v637_v14, 0.0 }
  0x40   :  { %v200_v27 = vrot.slane %v199_v22, 1  ;;  %v207_v28 = vrot.slane %v206_v23, 1  ;;  %v214_v29 = vrot.slane %v213_v25, 1  ;;  %493 = vrsqrt.f32 %v642_v26 }
  0x41   :  { %v221_v3 = vrot.slane %v220_v36, 1  ;;  %v245_v51 = vand.u32 2147483648, %v637_v14  ;;  %vm254_vm8 = vcmp.eq.f32.partialorder %v639_v19, inf  ;;  %vm256_vm9 = vcmp.eq.f32.partialorder %v639_v19, 0.0 }
  0x42   :  { %v646_v31 = vadd.f32 %v200_v27, %v199_v22  ;;  %v648_v32 = vadd.f32 %v207_v28, %v206_v23  ;;  %v650_v33 = vadd.f32 %v214_v29, %v213_v25  ;;  %v257_v4 = vand.u32 2147483648, %v639_v19 }
  0x43   :  { %v488_v34 = vpop.eup %487  ;;  %v673_v58 = vadd.f32 %v221_v3, %v220_v36  ;;  %vm266_vm10 = vcmp.eq.f32.partialorder %v642_v26, inf  ;;  %vm268_vm11 = vcmp.eq.f32.partialorder %v642_v26, 0.0 }
  0x44   :  { %v224_v20 = vmul.f32 %v488_v34, %v635_v13  ;;  %495 = vrsqrt.f32 %v646_v31  ;;  %v490_v35 = vpop.eup %489  ;;  %vm278_vm12 = vcmp.eq.f32.partialorder %v646_v31, inf  ;;  %v281_v30 = vand.u32 2147483648, %v646_v31 }
  0x45   :  { %497 = vrsqrt.f32 %v648_v32  ;;  %v236_v38 = vmul.f32 %v490_v35, %v637_v14  ;;  %v492_v39 = vpop.eup %491  ;;  %vm280_vm13 = vcmp.eq.f32.partialorder %v646_v31, 0.0  ;;  %vm290_vm14 = vcmp.eq.f32.partialorder %v648_v32, inf }
  0x46   :  { %v225_v37 = vmul.f32 %v488_v34, %v224_v20  ;;  %499 = vrsqrt.f32 %v650_v33  ;;  %v248_v42 = vmul.f32 %v492_v39, %v639_v19  ;;  %v494_v43 = vpop.eup %493  ;;  %vm292_vm15 = vcmp.eq.f32.partialorder %v648_v32, 0.0 }
  0x47   :  { %v237_v41 = vmul.f32 %v490_v35, %v236_v38  ;;  %v260_v49 = vmul.f32 %v494_v43, %v642_v26  ;;  %501 = vrsqrt.f32 %v673_v58  ;;  %v293_v38 = vand.u32 2147483648, %v648_v32 }
  0x48   :  { %v226_v40 = vmul.f32 0.5, %v225_v37  ;;  %v249_v48 = vmul.f32 %v492_v39, %v248_v42  ;;  %vm302_vm1 = vcmp.eq.f32.partialorder %v650_v33, inf  ;;  %v317_v3 = vand.u32 2147483648, %v673_v58 }
  0x49   :  { %v238_v47 = vmul.f32 0.5, %v237_v41  ;;  %v261_v57 = vmul.f32 %v494_v43, %v260_v49 }
  0x4a   :  { %v496_v45 = vpop.eup %495  ;;  %v227_v46 = vsub.f32 1.5, %v226_v40  ;;  %v250_v56 = vmul.f32 0.5, %v249_v48 }
  0x4b   :  { %v664_v50 = vpop.eup %497  ;;  %v272_v52 = vmul.f32 %v496_v45, %v646_v31  ;;  %v239_v55 = vsub.f32 1.5, %v238_v47  ;;  %v262_v1 = vmul.f32 0.5, %v261_v57 }
  0x4c   :  { %v670_v53 = vpop.eup %499  ;;  %v228_v54 = vmul.f32 %v488_v34, %v227_v46  ;;  %v284_v60 = vmul.f32 %v664_v50, %v648_v32  ;;  %v251_v0 = vsub.f32 1.5, %v250_v56 }
  0x4d   :  { %v273_v59 = vmul.f32 %v496_v45, %v272_v52  ;;  %v296_v61 = vmul.f32 %v670_v53, %v650_v33  ;;  %v240_v63 = vmul.f32 %v490_v35, %v239_v55  ;;  %v263_v10 = vsub.f32 1.5, %v262_v1  ;;  %v719_v36 = vpop.eup %501 }
  0x4e   :  { %v229_v62 = vmul.f32 %v228_v54, %v635_v13  ;;  %v285_v6 = vmul.f32 %v664_v50, %v284_v60  ;;  %v252_v9 = vmul.f32 %v492_v39, %v251_v0  ;;  %v308_v47 = vmul.f32 %v719_v36, %v673_v58 }
  0x4f   :  { %v274_v5 = vmul.f32 0.5, %v273_v59  ;;  %v241_v8 = vmul.f32 %v240_v63, %v637_v14  ;;  %v297_v15 = vmul.f32 %v670_v53, %v296_v61  ;;  %v264_v18 = vmul.f32 %v494_v43, %v263_v10 }
  0x50   :  { %v231_v7 = vsel %vm230_vm4, %v635_v13, %v229_v62  ;;  %v253_v17 = vmul.f32 %v252_v9, %v639_v19  ;;  %v269_v13 = vand.u32 2147483648, %v642_v26  ;;  %v286_v23 = vmul.f32 0.5, %v285_v6 }
  0x51   :  { %v234_v11 = vsel %vm232_vm5, %v233_v44, %v231_v7  ;;  %v275_v12 = vsub.f32 1.5, %v274_v5  ;;  %v243_v16 = vsel %vm242_vm6, %v637_v14, %v241_v8  ;;  %v265_v27 = vmul.f32 %v264_v18, %v642_v26 }
  0x52   :  { %v695_v21 = vadd.f32 1e-08, %v234_v11  ;;  %v246_v22 = vsel %vm244_vm7, %v245_v51, %v243_v16  ;;  %v255_v25 = vsel %vm254_vm8, %v639_v19, %v253_v17  ;;  %v298_v35 = vmul.f32 0.5, %v297_v15 }
  0x53   :  { %v705_v28 = vadd.f32 1e-08, %v246_v22  ;;  %v258_v29 = vsel %vm256_vm9, %v257_v4, %v255_v25  ;;  %v276_v14 = vmul.f32 %v496_v45, %v275_v12  ;;  %v267_v34 = vsel %vm266_vm10, %v642_v26, %v265_v27 }
  0x54   :  { %503 = vrcp.f32 %v695_v21  ;;  %v715_v20 = vadd.f32 1e-08, %v258_v29  ;;  %v270_v19 = vsel %vm268_vm11, %v269_v13, %v267_v34  ;;  %v338_v37 = vand.u32 2147483648, %v695_v21 }
  0x55   :  { %505 = vrcp.f32 %v705_v28  ;;  %v726_v39 = vadd.f32 1e-08, %v270_v19  ;;  %v352_v40 = vand.u32 2147483648, %v705_v28  ;;  %v287_v41 = vsub.f32 1.5, %v286_v23 }
  0x56   :  { %507 = vrcp.f32 %v715_v20  ;;  %v350_v42 = vand.u32 2147483647, %v705_v28  ;;  %v277_v43 = vmul.f32 %v276_v14, %v646_v31  ;;  %v305_v26 = vand.u32 2147483648, %v650_v33 }
  0x57   :  { %v336_v45 = vand.u32 2147483647, %v695_v21  ;;  %509 = vrcp.f32 %v726_v39  ;;  %v299_v46 = vsub.f32 1.5, %v298_v35  ;;  %v744_v49 = vor.u32 1.1754944e-38, %v338_v37 }
  0x58   :  { %vm346_vm4 = vweird.f32 %v705_v28  ;;  %v364_v51 = vand.u32 2147483647, %v715_v20  ;;  %vm332_vm5 = vweird.f32 %v695_v21  ;;  %v353_v54 = vor.u32 1.1754944e-38, %v352_v40 }
  0x59   :  { %v366_v55 = vand.u32 2147483648, %v715_v20  ;;  %v279_v56 = vsel %vm278_vm12, %v646_v31, %v277_v43  ;;  %v288_v57 = vmul.f32 %v664_v50, %v287_v41  ;;  %vm304_vm6 = vcmp.eq.f32.partialorder %v650_v33, 0.0 }
  0x5a   :  { %v736_v44 = vpop.eup %503  ;;  %vm757_vm8 = vcmp.eq.f32.partialorder %v350_v42, 8.507059e+37  ;;  %vm360_vm9 = vweird.f32 %v715_v20  ;;  %v378_v62 = vand.u32 2147483647, %v726_v39  ;;  %v380_v0 = vand.u32 2147483648, %v726_v39 }
  0x5b   :  { %v328_v48 = vmul.f32 %v736_v44, %v695_v21  ;;  %v506_v52 = vpop.eup %505  ;;  %vm333_vm7 = vweird.f32 %v736_v44  ;;  %v289_v50 = vmul.f32 %v288_v57, %v648_v32  ;;  %v300_v1 = vmul.f32 %v670_v53, %v299_v46 }
  0x5c   :  { %v342_v60 = vmul.f32 %v506_v52, %v705_v28  ;;  %v508_v63 = vpop.eup %507  ;;  %v309_v4 = vmul.f32 %v719_v36, %v308_v47  ;;  %vm769_vm10 = vcmp.eq.f32.partialorder %v364_v51, 8.507059e+37  ;;  %vm374_vm11 = vweird.f32 %v726_v39 }
  0x5d   :  { %v329_v59 = vsub.f32 1.0, %v328_v48  ;;  %v356_v7 = vmul.f32 %v508_v63, %v715_v20  ;;  %v282_v9 = vsel %vm280_vm13, %v281_v30, %v279_v56  ;;  %vm314_vm12 = vcmp.eq.f32.partialorder %v673_v58, inf  ;;  %v510_v10 = vpop.eup %509 }
  0x5e   :  { %v343_v6 = vsub.f32 1.0, %v342_v60  ;;  %vm347_vm3 = vweird.f32 %v506_v52  ;;  %v291_v53 = vsel %vm290_vm14, %v648_v32, %v289_v50  ;;  %v301_v11 = vmul.f32 %v300_v1, %v650_v33 }
  0x5f   :  { %v330_v5 = vmul.f32 %v736_v44, %v329_v59  ;;  %v310_v12 = vmul.f32 0.5, %v309_v4  ;;  %vm782_vm0 = vcmp.eq.f32.partialorder %v336_v45, 8.507059e+37  ;;  %v357_v31 = vsub.f32 1.0, %v356_v7  ;;  %vm348_vm14 = vmor %vm346_vm4, %vm347_vm3 }
  0x60   :  { %v344_v16 = vmul.f32 %v506_v52, %v343_v6  ;;  %vm361_vm13 = vweird.f32 %v508_v63  ;;  %v370_v17 = vmul.f32 %v510_v10, %v726_v39  ;;  %v294_v18 = vsel %vm292_vm15, %v293_v38, %v291_v53  ;;  %vm805_vm15 = vmor %vm332_vm5, %vm333_vm7 }
  0x61   :  { %v303_v22 = vsel %vm302_vm1, %v650_v33, %v301_v11  ;;  %v311_v13 = vsub.f32 1.5, %v310_v12  ;;  %v792_v23 = vadd.f32 1e-08, %v282_v9  ;;  %v331_v25 = vadd.f32 %v736_v44, %v330_v5  ;;  %vm362_vm3 = vmor %vm360_vm9, %vm361_vm13 }
  0x62   :  { %v345_v27 = vadd.f32 %v506_v52, %v344_v16  ;;  %v358_v29 = vmul.f32 %v508_v63, %v357_v31  ;;  %v371_v14 = vsub.f32 1.0, %v370_v17  ;;  %v367_v30 = vor.u32 1.1754944e-38, %v366_v55 }
  0x63   :  { %vm375_vm2 = vweird.f32 %v510_v10  ;;  %v312_v32 = vmul.f32 %v719_v36, %v311_v13  ;;  %v799_v34 = vadd.f32 1e-08, %v294_v18  ;;  %v306_v28 = vsel %vm304_vm6, %v305_v26, %v303_v22 }
  0x64   :  { %v349_v19 = vsel %vm348_vm14, %v506_v52, %v345_v27  ;;  %v359_v37 = vadd.f32 %v508_v63, %v358_v29  ;;  %v372_v38 = vmul.f32 %v510_v10, %v371_v14  ;;  %v381_v21 = vor.u32 1.1754944e-38, %v380_v0  ;;  %vm376_vm1 = vmor %vm374_vm11, %vm375_vm2 }
  0x65   :  { %v354_v36 = vsel %vm757_vm8, %v353_v54, %v349_v19  ;;  %v313_v40 = vmul.f32 %v312_v32, %v673_v58  ;;  %511 = vrcp.f32 %v792_v23  ;;  %v335_v41 = vsel %vm805_vm15, %v736_v44, %v331_v25 }
  0x66   :  { %v363_v42 = vsel %vm362_vm3, %v508_v63, %v359_v37  ;;  %v373_v43 = vadd.f32 %v510_v10, %v372_v38  ;;  %v447_v33 = vrot.slane %v354_v36, 6  ;;  %v325_v45 = vadd.f32 1e-08, %v306_v28 }
  0x67   :  { %v368_v26 = vsel %vm769_vm10, %v367_v30, %v363_v42  ;;  %v315_v20 = vsel %vm314_vm12, %v673_v58, %v313_v40  ;;  %513 = vrcp.f32 %v799_v34  ;;  %vm379_vm4 = vcmp.eq.f32.partialorder %v378_v62, 8.507059e+37 }
  0x68   :  { %v377_v46 = vsel %vm376_vm1, %v510_v10, %v373_v43  ;;  %v448_v44 = vrot.slane %v368_v26, 4  ;;  %vm888_vm5 = vcmp.eq.f32.partialorder %v673_v58, 0.0  ;;  %v340_v39 = vsel %vm782_vm0, %v744_v49, %v335_v41 }
  0x69   :  { %v318_v47 = vsel %vm888_vm5, %v317_v3, %v315_v20  ;;  %v382_v48 = vsel %vm379_vm4, %v381_v21, %v377_v46  ;;  %vm889_vm2 = vcmask 1041408   ;;  %515 = vrcp.f32 %v325_v45 }
  0x6a   :  { %v449_v51 = vrot.slane %v382_v48, 2  ;;  %v453_v52 = vsel %vm889_vm2, %v340_v39, %v447_v33  ;;  %v326_v55 = vadd.f32 1e-08, %v318_v47  ;;  %vm890_vm6 = vcmask 1045508  }
  0x6b   :  { %v840_v54 = vpop.eup %511  ;;  %vm891_vm7 = vcmask 1043456   ;;  %vm402_vm8 = vweird.f32 %v799_v34  ;;  %v408_v50 = vand.u32 2147483648, %v799_v34  ;;  %v406_v5 = vand.u32 2147483647, %v799_v34 }
  0x6c   :  { %v454_v56 = vsel %vm890_vm6, %v448_v44, %v449_v51  ;;  %v384_v57 = vmul.f32 %v840_v54, %v792_v23  ;;  %517 = vrcp.f32 %v326_v55  ;;  %vm388_vm9 = vweird.f32 %v792_v23 }
  0x6d   :  { %v514_v59 = vpop.eup %513  ;;  %v455_v58 = vsel %vm891_vm7, %v453_v52, %v454_v56  ;;  %v392_v7 = vand.u32 2147483647, %v792_v23  ;;  %v420_v9 = vand.u32 2147483647, %v325_v45  ;;  %v422_v10 = vand.u32 2147483648, %v325_v45 }
  0x6e   :  { %v461_v3 = vmul.f32 %v455_v58, %v613_v24  ;;  %v398_v49 = vmul.f32 %v514_v59, %v799_v34  ;;  %v385_v60 = vsub.f32 1.0, %v384_v57  ;;  %vm403_vm0 = vweird.f32 %v514_v59 }
  0x6f   :  { %v516_v62 = vpop.eup %515  ;;  %vm854_vm10 = vmor %vm402_vm8, %vm403_vm0  ;;  %vm389_vm12 = vweird.f32 %v840_v54  ;;  %v394_v15 = vand.u32 2147483648, %v792_v23  ;;  %v409_v16 = vor.u32 1.1754944e-38, %v408_v50  ;;  %vm416_vm13 = vweird.f32 %v325_v45 }
  0x70   :  { %463 = vst [vmem:[#allocation5] sm:$0xff] %v461_v3  ;;  %v399_v61 = vsub.f32 1.0, %v398_v49  ;;  %v412_v0 = vmul.f32 %v516_v62, %v325_v45  ;;  %v386_v1 = vmul.f32 %v840_v54, %v385_v60  ;;  %vm417_vm11 = vweird.f32 %v516_v62  ;;  %vm390_vm4 = vmor %vm388_vm9, %vm389_vm12 }
  0x71   :  { %vm407_vm14 = vcmp.eq.f32.partialorder %v406_v5, 8.507059e+37  ;;  %vm418_vm15 = vmor %vm416_vm13, %vm417_vm11  ;;  %vm421_vm3 = vcmp.eq.f32.partialorder %v420_v9, 8.507059e+37  ;;  %v423_v13 = vor.u32 1.1754944e-38, %v422_v10  ;;  %v436_v25 = vand.u32 2147483648, %v326_v55 }
  0x72   :  { %v400_v63 = vmul.f32 %v514_v59, %v399_v61  ;;  %v413_v24 = vsub.f32 1.0, %v412_v0  ;;  %v518_v6 = vpop.eup %517  ;;  %v387_v31 = vadd.f32 %v840_v54, %v386_v1  ;;  %v434_v14 = vand.u32 2147483647, %v326_v55 }
  0x73   :  { %v426_v12 = vmul.f32 %v518_v6, %v326_v55  ;;  %vm431_vm1 = vweird.f32 %v518_v6  ;;  %vm430_vm5 = vweird.f32 %v326_v55  ;;  %v395_v19 = vor.u32 1.1754944e-38, %v394_v15 }
  0x74   :  { %v401_v4 = vadd.f32 %v514_v59, %v400_v63  ;;  %v414_v11 = vmul.f32 %v516_v62, %v413_v24  ;;  %v391_v32 = vsel %vm390_vm4, %v840_v54, %v387_v31  ;;  %vm432_vm2 = vmor %vm430_vm5, %vm431_vm1  ;;  %v437_v37 = vor.u32 1.1754944e-38, %v436_v25 }
  0x75   :  { %v427_v18 = vsub.f32 1.0, %v426_v12  ;;  %vm393_vm6 = vcmp.eq.f32.partialorder %v392_v7, 8.507059e+37  ;;  %vm435_vm7 = vcmp.eq.f32.partialorder %v434_v14, 8.507059e+37  ;;  %vm894_vm0 = vcmask 1041408  }
  0x76   :  { %v405_v53 = vsel %vm854_vm10, %v514_v59, %v401_v4  ;;  %v415_v17 = vadd.f32 %v516_v62, %v414_v11  ;;  %v396_v36 = vsel %vm393_vm6, %v395_v19, %v391_v32  ;;  %vm895_vm8 = vcmask 1045508  }
  0x77   :  { %v410_v22 = vsel %vm407_vm14, %v409_v16, %v405_v53  ;;  %v428_v29 = vmul.f32 %v518_v6, %v427_v18  ;;  %vm896_vm9 = vcmask 1043456  }
  0x78   :  { %v419_v27 = vsel %vm418_vm15, %v516_v62, %v415_v17  ;;  %v450_v35 = vrot.slane %v410_v22, 6 }
  0x79   :  { %v424_v30 = vsel %vm421_vm3, %v423_v13, %v419_v27  ;;  %v429_v34 = vadd.f32 %v518_v6, %v428_v29 }
  0x7a   :  { %v451_v28 = vrot.slane %v424_v30, 4  ;;  %v456_v41 = vsel %vm894_vm0, %v396_v36, %v450_v35 }
  0x7b   :  { %v433_v38 = vsel %vm432_vm2, %v518_v6, %v429_v34 }
  0x7c   :  { %v438_v21 = vsel %vm435_vm7, %v437_v37, %v433_v38 }
  0x7d   :  { %v452_v40 = vrot.slane %v438_v21, 2 }
  0x7f   :  { %v457_v23 = vsel %vm895_vm8, %v451_v28, %v452_v40 }
  0x80   :  { %v458_v42 = vsel %vm896_vm9, %v456_v41, %v457_v23 }
  0x81   :  { %v462_v43 = vmul.f32 %v458_v42, %v623_v2 }
  0x83   :  { %464 = vst [vmem:[#allocation5 + $0x8] sm:$0xff] %v462_v43 }
  0x84   :  { %475 = dma.vmem_to_hbm [thread:$0]  %s471_s11, 256, %s473_s14, [#allocation4]  }
  0x85   :  { %569 = dma.done.wait [#allocation4], 256  }
  0x86   :  { %570 = vsyncadd [#allocation4], 4294967040 }
  0x87   :  { %480 = vsyncpa [#allocation3], 1 }
  0x88   :  { %481 = vsyncpa [#allocation4], 1 }

</bundles_post_ra>
